<compile_context>
chip_gen: v7x
topology: tpu7x:2x2x1
jax: 0.10.0
libtpu: 0.0.40
codegen_flags: <defaults>
</compile_context>

<pallas_src>
import jax
import jax.numpy as jnp
from jax.experimental import pallas as pl
from jax.experimental.pallas import tpu as pltpu

LANE = 128
SUBM = 16          # sublane multiple for bf16-packed input tiles


def _cdiv(a, b):
    return (a + b - 1) // b


def _round_up(a, b):
    return _cdiv(a, b) * b


# ----------------------------------------------------------------------------
# Pallas kernel: diag-covariance + whitened matched-filter detection
# ----------------------------------------------------------------------------
def _detect_kernel(y_ref, hd_ref, hu_ref, ev_ref, z_ref):
    """One (tm, 128) block of resource elements.

    y_ref  : [2, A, tm, 128]     bf16   received signal (real/imag planes)
    hd_ref : [2, A, K, tm, 128]  bf16   desired channels
    hu_ref : [2, A, U, tm, 128]  bf16   undesired / interfering channels
    ev_ref : [A, tm, 128]        bf16   noise variance + summed est. error
    z_ref  : [2, K, tm, 128]     f32    detected symbols (real/imag planes)
    """
    A = y_ref.shape[1]
    K = hd_ref.shape[2]
    U = hu_ref.shape[2]
    tile = y_ref.shape[2:]                      # (tm, 128)

    zr = [jnp.zeros(tile, jnp.float32) for _ in range(K)]
    zi = [jnp.zeros(tile, jnp.float32) for _ in range(K)]

    # TODO(synk): for large configs (A*K >~ 16) convert this antenna loop to
    # lax.fori_loop(..., unroll=2) to bound vreg live ranges; at the small
    # configs targeted here full unrolling keeps everything in registers.
    for a in range(A):
        # diag(S)[a] = no[a] + err_sum[a] + sum_u |h_und[a, u]|^2   (f32 accum)
        diag = ev_ref[a, :, :].astype(jnp.float32)
        for u in range(U):
            hr = hu_ref[0, a, u, :, :].astype(jnp.float32)
            hi = hu_ref[1, a, u, :, :].astype(jnp.float32)
            diag = diag + hr * hr + hi * hi
        diag = jnp.maximum(diag, jnp.float32(1e-20))      # never divide by 0
        inv = pl.reciprocal(diag)                         # exact; free under HBM stall

        wr = y_ref[0, a, :, :].astype(jnp.float32) * inv  # whitened y (real)
        wi = y_ref[1, a, :, :].astype(jnp.float32) * inv  # whitened y (imag)

        # z_k += conj(h_des[a, k]) * y[a] / diag[a]
        for k in range(K):
            hr = hd_ref[0, a, k, :, :].astype(jnp.float32)
            hi = hd_ref[1, a, k, :, :].astype(jnp.float32)
            zr[k] = zr[k] + hr * wr + hi * wi
            zi[k] = zi[k] + hr * wi - hi * wr

    for k in range(K):
        z_ref[0, k, :, :] = zr[k]
        z_ref[1, k, :, :] = zi[k]


def _vmem_budget_and_limit():
    """Per-core VMEM budget (for tiling) and the scoped limit to request."""
    try:
        cap = int(pltpu.get_tpu_info().vmem_capacity_bytes)
    except Exception:
        cap = 64 * 1024 * 1024              # conservative: v7x per-TC VMEM
    budget = min(int(cap * 0.45), 56 * 1024 * 1024)
    limit = min(cap, budget + 8 * 1024 * 1024)
    return budget, limit


def detect_pallas(y, hd, hu, ev, *, max_rows=512):
    """Inputs: y [2,A,N]; hd [2,A,K,N]; hu [2,A,U,N]; ev [A,N]  (bfloat16).
    Returns z [2,K,N] float32 (diagonally whitened matched filter)."""
    _, A, N = y.shape
    K = hd.shape[2]
    U = hu.shape[2]

    budget, vmem_limit = _vmem_budget_and_limit()

    # HBM bytes moved per resource element (bf16 inputs, f32 output).
    bytes_per_re = 2 * (2 * A + 2 * A * K + 2 * A * U + A) + 4 * 2 * K

    rows = _cdiv(N, LANE)
    tm_vmem = budget // (2 * bytes_per_re * LANE)            # double-buffered
    tm_grid = max(SUBM, _round_up(_cdiv(rows, 2), SUBM))     # keep >= 2 grid steps
    tm = max(SUBM, min(max_rows, tm_vmem, tm_grid) // SUBM * SUBM)

    block = tm * LANE
    Np = _round_up(N, block)
    Rp = Np // LANE
    pad_n = Np - N
    grid = (Np // block,)

    # NOTE: pad + reshape; XLA fuses this with the wrapper's stack/transpose so
    # there is a single HBM pass per operand outside the kernel.
    def prep(x, pad_value=0.0):
        x = jnp.pad(x, [(0, 0)] * (x.ndim - 1) + [(0, pad_n)],
                    constant_values=pad_value)
        return x.reshape(x.shape[:-1] + (Rp, LANE))

    y_, hd_, hu_ = prep(y), prep(hd), prep(hu)
    ev_ = prep(ev, pad_value=1.0)          # padded lanes never divide by zero

    flops = Np * A * (4 * U + 4 + 8 * K)
    cost = pl.CostEstimate(flops=int(flops),
                           transcendentals=int(Np * A),
                           bytes_accessed=int(Np * bytes_per_re))

    z = pl.pallas_call(
        _detect_kernel,
        out_shape=jax.ShapeDtypeStruct((2, K, Rp, LANE), jnp.float32),
        grid_spec=pltpu.PrefetchScalarGridSpec(
            num_scalar_prefetch=0,
            grid=grid,
            in_specs=[pl.BlockSpec((2, A, tm, LANE), lambda n: (0, 0, n, 0)),
                      pl.BlockSpec((2, A, K, tm, LANE), lambda n: (0, 0, 0, n, 0)),
                      pl.BlockSpec((2, A, U, tm, LANE), lambda n: (0, 0, 0, n, 0)),
                      pl.BlockSpec((A, tm, LANE), lambda n: (0, n, 0))],
            out_specs=pl.BlockSpec((2, K, tm, LANE), lambda n: (0, 0, n, 0))),
        compiler_params=pltpu.CompilerParams(
            dimension_semantics=("parallel",),
            vmem_limit_bytes=vmem_limit),
        cost_estimate=cost,
    )(y_, hd_, hu_, ev_)

    return z.reshape(2, K, Np)[..., :N]


# ----------------------------------------------------------------------------
# OFDMDetector wrapper (glue in plain JAX, hot path in the Pallas kernel)
# ----------------------------------------------------------------------------
class OFDMDetectorPallas:
    def __init__(self, sc_ind, mask, num_data_symbols, desired_ind, undesired_ind,
                 stream_ind, num_rx, num_streams_per_rx, num_tx, num_streams_per_tx,
                 output='symbol'):
        self.sc_ind = sc_ind                        # effective (non-nulled) subcarrier indices
        self.desired_ind = desired_ind              # stream-management detection_desired_ind
        self.undesired_ind = undesired_ind          # stream-management detection_undesired_ind
        self.stream_ind = stream_ind                # stream-management stream_ind
        self.num_rx = num_rx
        self.num_streams_per_rx = num_streams_per_rx
        self.num_tx = num_tx
        self.num_streams_per_tx = num_streams_per_tx
        self.output = output

        # data_ind: per (tx, stream), indices of data REs (mask==0), stable order.
        ntx, nspt, nofdm, neff = mask.shape
        m = mask.reshape(ntx * nspt, nofdm * neff)
        order = jnp.argsort(m, axis=-1, stable=True)
        self.data_ind = order.reshape(ntx, nspt, nofdm * neff)[..., :num_data_symbols]

    # ---- pre-processing (permutes / gathers, mirrors the PyTorch code) ----
    def _preprocess(self, y, h_hat, err_var, no):
        b, nrx, na, nofdm, _ = y.shape
        nspr = self.num_streams_per_rx

        # RemoveNulledSubcarriers
        y_eff = y[..., self.sc_ind]                                    # [b,nrx,na,nofdm,neff]
        y_dt = jnp.transpose(y_eff, (0, 1, 3, 4, 2))                   # [b,nrx,nofdm,neff,na]

        err = jnp.broadcast_to(err_var, h_hat.shape).astype(jnp.float32)
        err = jnp.transpose(err, (0, 1, 5, 6, 2, 3, 4))                # [b,nrx,nofdm,neff,na,ntx,nspt]
        err = err.reshape(err.shape[:-2] + (-1,))                      # flatten last 2
        err_sum = err.sum(-1)                                          # [b,nrx,nofdm,neff,na]

        h_dt = jnp.transpose(h_hat, (1, 3, 4, 0, 2, 5, 6))             # [nrx,ntx,nspt,b,na,nofdm,neff]
        h_dt = h_dt.reshape((-1,) + h_dt.shape[3:])                    # [nrx*ntx*nspt,b,na,nofdm,neff]
        h_des = h_dt[self.desired_ind].reshape((nrx, nspr) + h_dt.shape[1:])
        h_und = h_dt[self.undesired_ind].reshape((nrx, -1) + h_dt.shape[1:])
        h_des = jnp.transpose(h_des, (2, 0, 4, 5, 3, 1))               # [b,nrx,nofdm,neff,na,nspr]
        h_und = jnp.transpose(h_und, (2, 0, 4, 5, 3, 1))               # [b,nrx,nofdm,neff,na,U]

        no_arr = jnp.asarray(no, jnp.float32)
        no_arr = no_arr.reshape(no_arr.shape + (1,) * (3 - no_arr.ndim))
        no_arr = jnp.broadcast_to(no_arr, (b, nrx, na))
        no_full = jnp.broadcast_to(no_arr[:, :, None, None, :],
                                   (b, nrx, nofdm, neff, na))
        return y_dt, h_des, h_und, no_full, err_sum

    # ---- data-symbol extraction (mirrors _extract_datasymbols) ----
    def _extract_datasymbols(self, z):
        rank_extended = z.ndim < 6
        while z.ndim < 6:
            z = z[..., None]
        z = jnp.transpose(z, (1, 4, 2, 3, 5, 0))                       # [nrx,nspr,nofdm,neff,.,b]
        z = z.reshape((-1,) + z.shape[2:])                             # [nrx*nspr,...]
        z = z[self.stream_ind]                                         # reorder to tx ordering
        z = z.reshape((self.num_tx, self.num_streams_per_tx) + z.shape[1:])
        z = z.reshape(z.shape[:2] + (z.shape[2] * z.shape[3],) + z.shape[4:])
        idx = self.data_ind[..., None, None]
        z = jnp.take_along_axis(z, idx, axis=2)                        # [ntx,nspt,nd,.,b]
        z = jnp.transpose(z, (4, 0, 1, 2, 3))                          # [b,ntx,nspt,nd,.]
        if self.output == 'bit':
            z = z.reshape(z.shape[:3] + (z.shape[3] * z.shape[4],))
        if rank_extended and z.shape[-1] == 1:
            z = z[..., 0]
        return z

    def __call__(self, inputs):
        y, h_hat, err_var, no = inputs
        y_dt, h_des, h_und, no_full, err_sum = self._preprocess(y, h_hat, err_var, no)
        b, nrx, nofdm, neff, na = y_dt.shape
        nspr = h_des.shape[-1]
        N = b * nrx * nofdm * neff

        def pack_complex(x, inner):
            # [b,nrx,nofdm,neff,*inner] complex -> [2,*inner,N] bf16 (real/imag)
            x = x.reshape((N,) + inner)
            x = jnp.moveaxis(x, 0, -1)
            return jnp.stack((x.real, x.imag)).astype(jnp.bfloat16)

        yp = pack_complex(y_dt, (na,))                                 # [2,A,N]
        hdp = pack_complex(h_des, (na, nspr))                          # [2,A,K,N]
        hup = pack_complex(h_und, (na, h_und.shape[-1]))               # [2,A,U,N]

        # Fold noise variance into the summed estimation error (one plane per
        # antenna instead of two); cast happens in this same fused pass.
        ev_total = (err_sum + no_full).astype(jnp.float32).reshape(N, na)
        ev_total = jnp.moveaxis(ev_total, 0, -1).astype(jnp.bfloat16)  # [A,N]

        z = detect_pallas(yp, hdp, hup, ev_total)                      # [2,nspr,N] f32

        zc = (z[0] + 1j * z[1]).astype(jnp.complex64)                  # [nspr, N]
        zc = jnp.moveaxis(zc, -1, 0).reshape(b, nrx, nofdm, neff, nspr)
        return self._extract_datasymbols(zc)


# ----------------------------------------------------------------------------
if __name__ == "__main__":
    key = jax.random.PRNGKey(0)

    # small synthetic resource grid / stream management
    b, nrx, na, ntx, nspt, nofdm, fft = 2, 2, 4, 2, 1, 4, 20
    guard = 2
    sc_ind = jnp.arange(guard, fft - guard, dtype=jnp.int32)   # 16 effective subcarriers
    neff = int(sc_ind.shape[0])

    # pilot pattern: OFDM symbol 0 carries pilots, the rest is data
    mask = jnp.zeros((ntx, nspt, nofdm, neff), jnp.int32).at[:, :, 0, :].set(1)
    num_data_symbols = int((mask[0, 0] == 0).sum())

    # stream management: rx0<->tx0, rx1<->tx1 ; h_dt dim-0 order is (rx, tx, stream)
    detector = OFDMDetectorPallas(
        sc_ind=sc_ind, mask=mask, num_data_symbols=num_data_symbols,
        desired_ind=jnp.array([0, 3], jnp.int32),
        undesired_ind=jnp.array([1, 2], jnp.int32),
        stream_ind=jnp.array([0, 1], jnp.int32),
        num_rx=nrx, num_streams_per_rx=1,
        num_tx=ntx, num_streams_per_tx=nspt,
        output='symbol')

    k1, k2, k3, k4 = jax.random.split(key, 4)
    y = (jax.random.normal(k1, (b, nrx, na, nofdm, fft)) +
         1j * jax.random.normal(k2, (b, nrx, na, nofdm, fft))).astype(jnp.complex64)
    h_hat = (jax.random.normal(k3, (b, nrx, na, ntx, nspt, nofdm, neff)) +
             1j * jax.random.normal(k4, (b, nrx, na, ntx, nspt, nofdm, neff))).astype(jnp.complex64)
    err_var = jnp.full((1, 1, 1, 1, 1, 1, neff), 0.01, jnp.float32)
    no = jnp.float32(0.1)

    z = detector([y, h_hat, err_var, no])
    z = jax.block_until_ready(z)
    assert z.shape == (b, ntx, nspt, num_data_symbols), z.shape
    assert z.dtype == jnp.complex64, z.dtype
    assert bool(jnp.all(jnp.isfinite(z.real)) & jnp.all(jnp.isfinite(z.imag)))
    print("KERNEL_OK")
</pallas_src>

<mosaic_0001>
module attributes {stable_mosaic.version = 11 : i64} {
  func.func @_detect_kernel(%arg0: i32, %arg1: memref<2x4x16x128xbf16, #tpu.memory_space<vmem>>, %arg2: memref<2x4x1x16x128xbf16, #tpu.memory_space<vmem>>, %arg3: memref<2x4x1x16x128xbf16, #tpu.memory_space<vmem>>, %arg4: memref<4x16x128xbf16, #tpu.memory_space<vmem>>, %arg5: memref<2x1x16x128xf32, #tpu.memory_space<vmem>>) attributes {dimension_semantics = [#tpu.dimension_semantics<parallel>], iteration_bounds = array<i64: 1>, scalar_prefetch = 0 : i64, scratch_operands = 0 : i64, tpu.core_type = #tpu.core_type<tc>, window_params = [{transform_indices = @transform_0, window_bounds = array<i64: 2, 4, 16, 128>}, {transform_indices = @transform_1, window_bounds = array<i64: 2, 4, 1, 16, 128>}, {transform_indices = @transform_2, window_bounds = array<i64: 2, 4, 1, 16, 128>}, {transform_indices = @transform_3, window_bounds = array<i64: 4, 16, 128>}, {transform_indices = @transform_4, window_bounds = array<i64: 2, 1, 16, 128>}]} {
    %cst = arith.constant 0.000000e+00 : f32
    %0 = vector.broadcast %cst : f32 to vector<16x128xf32>
    %cst_0 = arith.constant 0.000000e+00 : f32
    %1 = vector.broadcast %cst_0 : f32 to vector<16x128xf32>
    %c0 = arith.constant 0 : index
    %c0_1 = arith.constant 0 : index
    %c0_2 = arith.constant 0 : index
    %2 = vector.load %arg4[%c0, %c0_1, %c0_2] : memref<4x16x128xbf16, #tpu.memory_space<vmem>>, vector<1x16x128xbf16>
    %3 = vector.shape_cast %2 : vector<1x16x128xbf16> to vector<16x128xbf16>
    %4 = arith.extf %3 : vector<16x128xbf16> to vector<16x128xf32>
    %c0_3 = arith.constant 0 : index
    %c0_4 = arith.constant 0 : index
    %c0_5 = arith.constant 0 : index
    %c0_6 = arith.constant 0 : index
    %c0_7 = arith.constant 0 : index
    %5 = vector.load %arg3[%c0_3, %c0_4, %c0_5, %c0_6, %c0_7] : memref<2x4x1x16x128xbf16, #tpu.memory_space<vmem>>, vector<1x1x1x16x128xbf16>
    %6 = vector.shape_cast %5 : vector<1x1x1x16x128xbf16> to vector<16x128xbf16>
    %7 = arith.extf %6 : vector<16x128xbf16> to vector<16x128xf32>
    %c1 = arith.constant 1 : index
    %c0_8 = arith.constant 0 : index
    %c0_9 = arith.constant 0 : index
    %c0_10 = arith.constant 0 : index
    %c0_11 = arith.constant 0 : index
    %8 = vector.load %arg3[%c1, %c0_8, %c0_9, %c0_10, %c0_11] : memref<2x4x1x16x128xbf16, #tpu.memory_space<vmem>>, vector<1x1x1x16x128xbf16>
    %9 = vector.shape_cast %8 : vector<1x1x1x16x128xbf16> to vector<16x128xbf16>
    %10 = arith.extf %9 : vector<16x128xbf16> to vector<16x128xf32>
    %11 = arith.mulf %7, %7 : vector<16x128xf32>
    %12 = arith.addf %4, %11 : vector<16x128xf32>
    %13 = arith.mulf %10, %10 : vector<16x128xf32>
    %14 = arith.addf %12, %13 : vector<16x128xf32>
    %cst_12 = arith.constant 9.99999968E-21 : f32
    %15 = vector.broadcast %cst_12 : f32 to vector<16x128xf32>
    %16 = arith.maximumf %14, %15 : vector<16x128xf32>
    %17 = tpu.reciprocal %16 : vector<16x128xf32> -> vector<16x128xf32>
    %c0_13 = arith.constant 0 : index
    %c0_14 = arith.constant 0 : index
    %c0_15 = arith.constant 0 : index
    %c0_16 = arith.constant 0 : index
    %18 = vector.load %arg1[%c0_13, %c0_14, %c0_15, %c0_16] : memref<2x4x16x128xbf16, #tpu.memory_space<vmem>>, vector<1x1x16x128xbf16>
    %19 = vector.shape_cast %18 : vector<1x1x16x128xbf16> to vector<16x128xbf16>
    %20 = arith.extf %19 : vector<16x128xbf16> to vector<16x128xf32>
    %21 = arith.mulf %20, %17 : vector<16x128xf32>
    %c1_17 = arith.constant 1 : index
    %c0_18 = arith.constant 0 : index
    %c0_19 = arith.constant 0 : index
    %c0_20 = arith.constant 0 : index
    %22 = vector.load %arg1[%c1_17, %c0_18, %c0_19, %c0_20] : memref<2x4x16x128xbf16, #tpu.memory_space<vmem>>, vector<1x1x16x128xbf16>
    %23 = vector.shape_cast %22 : vector<1x1x16x128xbf16> to vector<16x128xbf16>
    %24 = arith.extf %23 : vector<16x128xbf16> to vector<16x128xf32>
    %25 = arith.mulf %24, %17 : vector<16x128xf32>
    %c0_21 = arith.constant 0 : index
    %c0_22 = arith.constant 0 : index
    %c0_23 = arith.constant 0 : index
    %c0_24 = arith.constant 0 : index
    %c0_25 = arith.constant 0 : index
    %26 = vector.load %arg2[%c0_21, %c0_22, %c0_23, %c0_24, %c0_25] : memref<2x4x1x16x128xbf16, #tpu.memory_space<vmem>>, vector<1x1x1x16x128xbf16>
    %27 = vector.shape_cast %26 : vector<1x1x1x16x128xbf16> to vector<16x128xbf16>
    %28 = arith.extf %27 : vector<16x128xbf16> to vector<16x128xf32>
    %c1_26 = arith.constant 1 : index
    %c0_27 = arith.constant 0 : index
    %c0_28 = arith.constant 0 : index
    %c0_29 = arith.constant 0 : index
    %c0_30 = arith.constant 0 : index
    %29 = vector.load %arg2[%c1_26, %c0_27, %c0_28, %c0_29, %c0_30] : memref<2x4x1x16x128xbf16, #tpu.memory_space<vmem>>, vector<1x1x1x16x128xbf16>
    %30 = vector.shape_cast %29 : vector<1x1x1x16x128xbf16> to vector<16x128xbf16>
    %31 = arith.extf %30 : vector<16x128xbf16> to vector<16x128xf32>
    %32 = arith.mulf %28, %21 : vector<16x128xf32>
    %33 = arith.addf %0, %32 : vector<16x128xf32>
    %34 = arith.mulf %31, %25 : vector<16x128xf32>
    %35 = arith.addf %33, %34 : vector<16x128xf32>
    %36 = arith.mulf %28, %25 : vector<16x128xf32>
    %37 = arith.addf %1, %36 : vector<16x128xf32>
    %38 = arith.mulf %31, %21 : vector<16x128xf32>
    %39 = arith.subf %37, %38 : vector<16x128xf32>
    %c1_31 = arith.constant 1 : index
    %c0_32 = arith.constant 0 : index
    %c0_33 = arith.constant 0 : index
    %40 = vector.load %arg4[%c1_31, %c0_32, %c0_33] : memref<4x16x128xbf16, #tpu.memory_space<vmem>>, vector<1x16x128xbf16>
    %41 = vector.shape_cast %40 : vector<1x16x128xbf16> to vector<16x128xbf16>
    %42 = arith.extf %41 : vector<16x128xbf16> to vector<16x128xf32>
    %c0_34 = arith.constant 0 : index
    %c1_35 = arith.constant 1 : index
    %c0_36 = arith.constant 0 : index
    %c0_37 = arith.constant 0 : index
    %c0_38 = arith.constant 0 : index
    %43 = vector.load %arg3[%c0_34, %c1_35, %c0_36, %c0_37, %c0_38] : memref<2x4x1x16x128xbf16, #tpu.memory_space<vmem>>, vector<1x1x1x16x128xbf16>
    %44 = vector.shape_cast %43 : vector<1x1x1x16x128xbf16> to vector<16x128xbf16>
    %45 = arith.extf %44 : vector<16x128xbf16> to vector<16x128xf32>
    %c1_39 = arith.constant 1 : index
    %c1_40 = arith.constant 1 : index
    %c0_41 = arith.constant 0 : index
    %c0_42 = arith.constant 0 : index
    %c0_43 = arith.constant 0 : index
    %46 = vector.load %arg3[%c1_39, %c1_40, %c0_41, %c0_42, %c0_43] : memref<2x4x1x16x128xbf16, #tpu.memory_space<vmem>>, vector<1x1x1x16x128xbf16>
    %47 = vector.shape_cast %46 : vector<1x1x1x16x128xbf16> to vector<16x128xbf16>
    %48 = arith.extf %47 : vector<16x128xbf16> to vector<16x128xf32>
    %49 = arith.mulf %45, %45 : vector<16x128xf32>
    %50 = arith.addf %42, %49 : vector<16x128xf32>
    %51 = arith.mulf %48, %48 : vector<16x128xf32>
    %52 = arith.addf %50, %51 : vector<16x128xf32>
    %cst_44 = arith.constant 9.99999968E-21 : f32
    %53 = vector.broadcast %cst_44 : f32 to vector<16x128xf32>
    %54 = arith.maximumf %52, %53 : vector<16x128xf32>
    %55 = tpu.reciprocal %54 : vector<16x128xf32> -> vector<16x128xf32>
    %c0_45 = arith.constant 0 : index
    %c1_46 = arith.constant 1 : index
    %c0_47 = arith.constant 0 : index
    %c0_48 = arith.constant 0 : index
    %56 = vector.load %arg1[%c0_45, %c1_46, %c0_47, %c0_48] : memref<2x4x16x128xbf16, #tpu.memory_space<vmem>>, vector<1x1x16x128xbf16>
    %57 = vector.shape_cast %56 : vector<1x1x16x128xbf16> to vector<16x128xbf16>
    %58 = arith.extf %57 : vector<16x128xbf16> to vector<16x128xf32>
    %59 = arith.mulf %58, %55 : vector<16x128xf32>
    %c1_49 = arith.constant 1 : index
    %c1_50 = arith.constant 1 : index
    %c0_51 = arith.constant 0 : index
    %c0_52 = arith.constant 0 : index
    %60 = vector.load %arg1[%c1_49, %c1_50, %c0_51, %c0_52] : memref<2x4x16x128xbf16, #tpu.memory_space<vmem>>, vector<1x1x16x128xbf16>
    %61 = vector.shape_cast %60 : vector<1x1x16x128xbf16> to vector<16x128xbf16>
    %62 = arith.extf %61 : vector<16x128xbf16> to vector<16x128xf32>
    %63 = arith.mulf %62, %55 : vector<16x128xf32>
    %c0_53 = arith.constant 0 : index
    %c1_54 = arith.constant 1 : index
    %c0_55 = arith.constant 0 : index
    %c0_56 = arith.constant 0 : index
    %c0_57 = arith.constant 0 : index
    %64 = vector.load %arg2[%c0_53, %c1_54, %c0_55, %c0_56, %c0_57] : memref<2x4x1x16x128xbf16, #tpu.memory_space<vmem>>, vector<1x1x1x16x128xbf16>
    %65 = vector.shape_cast %64 : vector<1x1x1x16x128xbf16> to vector<16x128xbf16>
    %66 = arith.extf %65 : vector<16x128xbf16> to vector<16x128xf32>
    %c1_58 = arith.constant 1 : index
    %c1_59 = arith.constant 1 : index
    %c0_60 = arith.constant 0 : index
    %c0_61 = arith.constant 0 : index
    %c0_62 = arith.constant 0 : index
    %67 = vector.load %arg2[%c1_58, %c1_59, %c0_60, %c0_61, %c0_62] : memref<2x4x1x16x128xbf16, #tpu.memory_space<vmem>>, vector<1x1x1x16x128xbf16>
    %68 = vector.shape_cast %67 : vector<1x1x1x16x128xbf16> to vector<16x128xbf16>
    %69 = arith.extf %68 : vector<16x128xbf16> to vector<16x128xf32>
    %70 = arith.mulf %66, %59 : vector<16x128xf32>
    %71 = arith.addf %35, %70 : vector<16x128xf32>
    %72 = arith.mulf %69, %63 : vector<16x128xf32>
    %73 = arith.addf %71, %72 : vector<16x128xf32>
    %74 = arith.mulf %66, %63 : vector<16x128xf32>
    %75 = arith.addf %39, %74 : vector<16x128xf32>
    %76 = arith.mulf %69, %59 : vector<16x128xf32>
    %77 = arith.subf %75, %76 : vector<16x128xf32>
    %c2 = arith.constant 2 : index
    %c0_63 = arith.constant 0 : index
    %c0_64 = arith.constant 0 : index
    %78 = vector.load %arg4[%c2, %c0_63, %c0_64] : memref<4x16x128xbf16, #tpu.memory_space<vmem>>, vector<1x16x128xbf16>
    %79 = vector.shape_cast %78 : vector<1x16x128xbf16> to vector<16x128xbf16>
    %80 = arith.extf %79 : vector<16x128xbf16> to vector<16x128xf32>
    %c0_65 = arith.constant 0 : index
    %c2_66 = arith.constant 2 : index
    %c0_67 = arith.constant 0 : index
    %c0_68 = arith.constant 0 : index
    %c0_69 = arith.constant 0 : index
    %81 = vector.load %arg3[%c0_65, %c2_66, %c0_67, %c0_68, %c0_69] : memref<2x4x1x16x128xbf16, #tpu.memory_space<vmem>>, vector<1x1x1x16x128xbf16>
    %82 = vector.shape_cast %81 : vector<1x1x1x16x128xbf16> to vector<16x128xbf16>
    %83 = arith.extf %82 : vector<16x128xbf16> to vector<16x128xf32>
    %c1_70 = arith.constant 1 : index
    %c2_71 = arith.constant 2 : index
    %c0_72 = arith.constant 0 : index
    %c0_73 = arith.constant 0 : index
    %c0_74 = arith.constant 0 : index
    %84 = vector.load %arg3[%c1_70, %c2_71, %c0_72, %c0_73, %c0_74] : memref<2x4x1x16x128xbf16, #tpu.memory_space<vmem>>, vector<1x1x1x16x128xbf16>
    %85 = vector.shape_cast %84 : vector<1x1x1x16x128xbf16> to vector<16x128xbf16>
    %86 = arith.extf %85 : vector<16x128xbf16> to vector<16x128xf32>
    %87 = arith.mulf %83, %83 : vector<16x128xf32>
    %88 = arith.addf %80, %87 : vector<16x128xf32>
    %89 = arith.mulf %86, %86 : vector<16x128xf32>
    %90 = arith.addf %88, %89 : vector<16x128xf32>
    %cst_75 = arith.constant 9.99999968E-21 : f32
    %91 = vector.broadcast %cst_75 : f32 to vector<16x128xf32>
    %92 = arith.maximumf %90, %91 : vector<16x128xf32>
    %93 = tpu.reciprocal %92 : vector<16x128xf32> -> vector<16x128xf32>
    %c0_76 = arith.constant 0 : index
    %c2_77 = arith.constant 2 : index
    %c0_78 = arith.constant 0 : index
    %c0_79 = arith.constant 0 : index
    %94 = vector.load %arg1[%c0_76, %c2_77, %c0_78, %c0_79] : memref<2x4x16x128xbf16, #tpu.memory_space<vmem>>, vector<1x1x16x128xbf16>
    %95 = vector.shape_cast %94 : vector<1x1x16x128xbf16> to vector<16x128xbf16>
    %96 = arith.extf %95 : vector<16x128xbf16> to vector<16x128xf32>
    %97 = arith.mulf %96, %93 : vector<16x128xf32>
    %c1_80 = arith.constant 1 : index
    %c2_81 = arith.constant 2 : index
    %c0_82 = arith.constant 0 : index
    %c0_83 = arith.constant 0 : index
    %98 = vector.load %arg1[%c1_80, %c2_81, %c0_82, %c0_83] : memref<2x4x16x128xbf16, #tpu.memory_space<vmem>>, vector<1x1x16x128xbf16>
    %99 = vector.shape_cast %98 : vector<1x1x16x128xbf16> to vector<16x128xbf16>
    %100 = arith.extf %99 : vector<16x128xbf16> to vector<16x128xf32>
    %101 = arith.mulf %100, %93 : vector<16x128xf32>
    %c0_84 = arith.constant 0 : index
    %c2_85 = arith.constant 2 : index
    %c0_86 = arith.constant 0 : index
    %c0_87 = arith.constant 0 : index
    %c0_88 = arith.constant 0 : index
    %102 = vector.load %arg2[%c0_84, %c2_85, %c0_86, %c0_87, %c0_88] : memref<2x4x1x16x128xbf16, #tpu.memory_space<vmem>>, vector<1x1x1x16x128xbf16>
    %103 = vector.shape_cast %102 : vector<1x1x1x16x128xbf16> to vector<16x128xbf16>
    %104 = arith.extf %103 : vector<16x128xbf16> to vector<16x128xf32>
    %c1_89 = arith.constant 1 : index
    %c2_90 = arith.constant 2 : index
    %c0_91 = arith.constant 0 : index
    %c0_92 = arith.constant 0 : index
    %c0_93 = arith.constant 0 : index
    %105 = vector.load %arg2[%c1_89, %c2_90, %c0_91, %c0_92, %c0_93] : memref<2x4x1x16x128xbf16, #tpu.memory_space<vmem>>, vector<1x1x1x16x128xbf16>
    %106 = vector.shape_cast %105 : vector<1x1x1x16x128xbf16> to vector<16x128xbf16>
    %107 = arith.extf %106 : vector<16x128xbf16> to vector<16x128xf32>
    %108 = arith.mulf %104, %97 : vector<16x128xf32>
    %109 = arith.addf %73, %108 : vector<16x128xf32>
    %110 = arith.mulf %107, %101 : vector<16x128xf32>
    %111 = arith.addf %109, %110 : vector<16x128xf32>
    %112 = arith.mulf %104, %101 : vector<16x128xf32>
    %113 = arith.addf %77, %112 : vector<16x128xf32>
    %114 = arith.mulf %107, %97 : vector<16x128xf32>
    %115 = arith.subf %113, %114 : vector<16x128xf32>
    %c3 = arith.constant 3 : index
    %c0_94 = arith.constant 0 : index
    %c0_95 = arith.constant 0 : index
    %116 = vector.load %arg4[%c3, %c0_94, %c0_95] : memref<4x16x128xbf16, #tpu.memory_space<vmem>>, vector<1x16x128xbf16>
    %117 = vector.shape_cast %116 : vector<1x16x128xbf16> to vector<16x128xbf16>
    %118 = arith.extf %117 : vector<16x128xbf16> to vector<16x128xf32>
    %c0_96 = arith.constant 0 : index
    %c3_97 = arith.constant 3 : index
    %c0_98 = arith.constant 0 : index
    %c0_99 = arith.constant 0 : index
    %c0_100 = arith.constant 0 : index
    %119 = vector.load %arg3[%c0_96, %c3_97, %c0_98, %c0_99, %c0_100] : memref<2x4x1x16x128xbf16, #tpu.memory_space<vmem>>, vector<1x1x1x16x128xbf16>
    %120 = vector.shape_cast %119 : vector<1x1x1x16x128xbf16> to vector<16x128xbf16>
    %121 = arith.extf %120 : vector<16x128xbf16> to vector<16x128xf32>
    %c1_101 = arith.constant 1 : index
    %c3_102 = arith.constant 3 : index
    %c0_103 = arith.constant 0 : index
    %c0_104 = arith.constant 0 : index
    %c0_105 = arith.constant 0 : index
    %122 = vector.load %arg3[%c1_101, %c3_102, %c0_103, %c0_104, %c0_105] : memref<2x4x1x16x128xbf16, #tpu.memory_space<vmem>>, vector<1x1x1x16x128xbf16>
    %123 = vector.shape_cast %122 : vector<1x1x1x16x128xbf16> to vector<16x128xbf16>
    %124 = arith.extf %123 : vector<16x128xbf16> to vector<16x128xf32>
    %125 = arith.mulf %121, %121 : vector<16x128xf32>
    %126 = arith.addf %118, %125 : vector<16x128xf32>
    %127 = arith.mulf %124, %124 : vector<16x128xf32>
    %128 = arith.addf %126, %127 : vector<16x128xf32>
    %cst_106 = arith.constant 9.99999968E-21 : f32
    %129 = vector.broadcast %cst_106 : f32 to vector<16x128xf32>
    %130 = arith.maximumf %128, %129 : vector<16x128xf32>
    %131 = tpu.reciprocal %130 : vector<16x128xf32> -> vector<16x128xf32>
    %c0_107 = arith.constant 0 : index
    %c3_108 = arith.constant 3 : index
    %c0_109 = arith.constant 0 : index
    %c0_110 = arith.constant 0 : index
    %132 = vector.load %arg1[%c0_107, %c3_108, %c0_109, %c0_110] : memref<2x4x16x128xbf16, #tpu.memory_space<vmem>>, vector<1x1x16x128xbf16>
    %133 = vector.shape_cast %132 : vector<1x1x16x128xbf16> to vector<16x128xbf16>
    %134 = arith.extf %133 : vector<16x128xbf16> to vector<16x128xf32>
    %135 = arith.mulf %134, %131 : vector<16x128xf32>
    %c1_111 = arith.constant 1 : index
    %c3_112 = arith.constant 3 : index
    %c0_113 = arith.constant 0 : index
    %c0_114 = arith.constant 0 : index
    %136 = vector.load %arg1[%c1_111, %c3_112, %c0_113, %c0_114] : memref<2x4x16x128xbf16, #tpu.memory_space<vmem>>, vector<1x1x16x128xbf16>
    %137 = vector.shape_cast %136 : vector<1x1x16x128xbf16> to vector<16x128xbf16>
    %138 = arith.extf %137 : vector<16x128xbf16> to vector<16x128xf32>
    %139 = arith.mulf %138, %131 : vector<16x128xf32>
    %c0_115 = arith.constant 0 : index
    %c3_116 = arith.constant 3 : index
    %c0_117 = arith.constant 0 : index
    %c0_118 = arith.constant 0 : index
    %c0_119 = arith.constant 0 : index
    %140 = vector.load %arg2[%c0_115, %c3_116, %c0_117, %c0_118, %c0_119] : memref<2x4x1x16x128xbf16, #tpu.memory_space<vmem>>, vector<1x1x1x16x128xbf16>
    %141 = vector.shape_cast %140 : vector<1x1x1x16x128xbf16> to vector<16x128xbf16>
    %142 = arith.extf %141 : vector<16x128xbf16> to vector<16x128xf32>
    %c1_120 = arith.constant 1 : index
    %c3_121 = arith.constant 3 : index
    %c0_122 = arith.constant 0 : index
    %c0_123 = arith.constant 0 : index
    %c0_124 = arith.constant 0 : index
    %143 = vector.load %arg2[%c1_120, %c3_121, %c0_122, %c0_123, %c0_124] : memref<2x4x1x16x128xbf16, #tpu.memory_space<vmem>>, vector<1x1x1x16x128xbf16>
    %144 = vector.shape_cast %143 : vector<1x1x1x16x128xbf16> to vector<16x128xbf16>
    %145 = arith.extf %144 : vector<16x128xbf16> to vector<16x128xf32>
    %146 = arith.mulf %142, %135 : vector<16x128xf32>
    %147 = arith.addf %111, %146 : vector<16x128xf32>
    %148 = arith.mulf %145, %139 : vector<16x128xf32>
    %149 = arith.addf %147, %148 : vector<16x128xf32>
    %150 = arith.mulf %142, %139 : vector<16x128xf32>
    %151 = arith.addf %115, %150 : vector<16x128xf32>
    %152 = arith.mulf %145, %135 : vector<16x128xf32>
    %153 = arith.subf %151, %152 : vector<16x128xf32>
    %c0_125 = arith.constant 0 : index
    %c0_126 = arith.constant 0 : index
    %c0_127 = arith.constant 0 : index
    %c0_128 = arith.constant 0 : index
    %154 = vector.load %arg5[%c0_125, %c0_126, %c0_127, %c0_128] : memref<2x1x16x128xf32, #tpu.memory_space<vmem>>, vector<1x1x16x128xf32>
    %155 = vector.shape_cast %154 : vector<1x1x16x128xf32> to vector<16x128xf32>
    %156 = vector.shape_cast %149 : vector<16x128xf32> to vector<1x1x16x128xf32>
    tpu.vector_store %arg5[%c0_125, %c0_126, %c0_127, %c0_128], %156 {strides = array<i32>} : memref<2x1x16x128xf32, #tpu.memory_space<vmem>>, vector<1x1x16x128xf32>,
    %c1_129 = arith.constant 1 : index
    %c0_130 = arith.constant 0 : index
    %c0_131 = arith.constant 0 : index
    %c0_132 = arith.constant 0 : index
    %157 = vector.load %arg5[%c1_129, %c0_130, %c0_131, %c0_132] : memref<2x1x16x128xf32, #tpu.memory_space<vmem>>, vector<1x1x16x128xf32>
    %158 = vector.shape_cast %157 : vector<1x1x16x128xf32> to vector<16x128xf32>
    %159 = vector.shape_cast %153 : vector<16x128xf32> to vector<1x1x16x128xf32>
    tpu.vector_store %arg5[%c1_129, %c0_130, %c0_131, %c0_132], %159 {strides = array<i32>} : memref<2x1x16x128xf32, #tpu.memory_space<vmem>>, vector<1x1x16x128xf32>,
    return
  }
  func.func @transform_0(%arg0: i32) -> (i32, i32, i32, i32) {
    %c0_i32 = arith.constant 0 : i32
    %c0_i32_0 = arith.constant 0 : i32
    %c0_i32_1 = arith.constant 0 : i32
    %c0_i32_2 = arith.constant 0 : i32
    return %c0_i32, %c0_i32_0, %arg0, %c0_i32_1 : i32, i32, i32, i32
  }
  func.func @transform_1(%arg0: i32) -> (i32, i32, i32, i32, i32) {
    %c0_i32 = arith.constant 0 : i32
    %c0_i32_0 = arith.constant 0 : i32
    %c0_i32_1 = arith.constant 0 : i32
    %c0_i32_2 = arith.constant 0 : i32
    %c0_i32_3 = arith.constant 0 : i32
    return %c0_i32, %c0_i32_0, %c0_i32_1, %arg0, %c0_i32_2 : i32, i32, i32, i32, i32
  }
  func.func @transform_2(%arg0: i32) -> (i32, i32, i32, i32, i32) {
    %c0_i32 = arith.constant 0 : i32
    %c0_i32_0 = arith.constant 0 : i32
    %c0_i32_1 = arith.constant 0 : i32
    %c0_i32_2 = arith.constant 0 : i32
    %c0_i32_3 = arith.constant 0 : i32
    return %c0_i32, %c0_i32_0, %c0_i32_1, %arg0, %c0_i32_2 : i32, i32, i32, i32, i32
  }
  func.func @transform_3(%arg0: i32) -> (i32, i32, i32) {
    %c0_i32 = arith.constant 0 : i32
    %c0_i32_0 = arith.constant 0 : i32
    %c0_i32_1 = arith.constant 0 : i32
    return %c0_i32, %arg0, %c0_i32_0 : i32, i32, i32
  }
  func.func @transform_4(%arg0: i32) -> (i32, i32, i32, i32) {
    %c0_i32 = arith.constant 0 : i32
    %c0_i32_0 = arith.constant 0 : i32
    %c0_i32_1 = arith.constant 0 : i32
    %c0_i32_2 = arith.constant 0 : i32
    return %c0_i32, %c0_i32_0, %arg0, %c0_i32_1 : i32, i32, i32, i32
  }
}

</mosaic_0001>

<bundles_post_ra>
// kernel: tpu_custom_call.1
= control target key start
LH: loop header
LB: loop body
LE: loop exit
PB: predicated region body
PF: predicated region fallthrough
CT: control target
= control target key end

     0   :  { %9 = vsyncpa [#allocation3], 0  ;;  %s908_s0 = inlined_call_operand.hbm [shape: bf16[2,4,16,128], index: 0, kind: input, shape index: {}]   ;;  %s909_s1 = inlined_call_operand.hbm [shape: bf16[2,4,1,16,128], index: 1, kind: input, shape index: {}]   ;;  %s910_s2 = inlined_call_operand.hbm [shape: bf16[2,4,1,16,128], index: 2, kind: input, shape index: {}]   ;;  %s911_s3 = inlined_call_operand.hbm [shape: bf16[4,16,128], index: 3, kind: input, shape index: {}]   ;;  %s912_s4 = inlined_call_operand.hbm [shape: f32[2,1,16,128], index: 4, kind: output, shape index: {}]  }
   0x1   :  { %10 = vsyncpa [#allocation6], 0 }
   0x2   :  { %11 = vsyncpa [#allocation9], 0 }
   0x3   :  { %12 = vsyncpa [#allocation4], 0  ;;  %s616_s15 = smov [#allocation5]   ;;  %s617_s17 = smov [#allocation2]  }
   0x4   :  { %s30_s16 = sshll.u32 %s616_s15, 4  ;;  %s18_s18 = sshll.u32 %s617_s17, 4  ;;  %s31_s16 = int_to_ptr.vmem [resolvable:$true] %s30_s16  ;;  %s650_s18 = int_to_ptr.vmem [resolvable:$true] %s18_s18 }
   0x5   :  { %s498_s21 = scalar_lea.hbm %s909_s1, 1024 }
   0x6   :  { %p499_p0 = scmp.ne.s32.totalorder %s909_s1, %s498_s21  ;;  %p502_p1 = scmp.lt.u32.totalorder %s498_s21, %s909_s1 }
   0x8   :  { %p504_p2 = pnand %p502_p1, %p499_p0 }
   0xa   :  { %507 = shalt.err (!%p504_p2)
}
   0xb   :  { %s508_s26 = scalar_lea.vmem %s31_s16, 1024  ;;  %p513_p4 = scmp.lt.s32.totalorder %s31_s16, %s31_s16 }
   0xc   :  { %p509_p3 = scmp.ne.s32.totalorder %s31_s16, %s508_s26  ;;  %p514_p5 = scmp.lt.s32.totalorder %s508_s26, %s508_s26 }
   0xe   :  { %p515_p6 = por %p514_p5, %p513_p4 }
  0x10   :  { %p516_p7 = pnand %p515_p6, %p509_p3 }
  0x12   :  { %519 = shalt.err (!%p516_p7)
}
  0x13   :  { %s618_s27 = smov 64   ;;  %s619_s28 = smov 4  }
  0x14   :  { %36 = dma.hbm_to_vmem [thread:$0]  %s909_s1, 1024, %s31_s16, [#allocation6], %s618_s27, %s618_s27, %s619_s28  }
  0x15   :  { %s520_s7 = scalar_lea.hbm %s908_s0, 1024 }
  0x16   :  { %p521_p8 = scmp.ne.s32.totalorder %s908_s0, %s520_s7  ;;  %p524_p9 = scmp.lt.u32.totalorder %s520_s7, %s908_s0 }
  0x18   :  { %p526_p10 = pnand %p524_p9, %p521_p8 }
  0x1a   :  { %529 = shalt.err (!%p526_p10)
}
  0x1b   :  { %s530_s12 = scalar_lea.vmem %s650_s18, 1024  ;;  %p535_p12 = scmp.lt.s32.totalorder %s650_s18, %s650_s18 }
  0x1c   :  { %p531_p11 = scmp.ne.s32.totalorder %s650_s18, %s530_s12  ;;  %p536_p13 = scmp.lt.s32.totalorder %s530_s12, %s530_s12 }
  0x1e   :  { %p537_p0 = por %p536_p13, %p535_p12 }
  0x20   :  { %p538_p1 = pnand %p537_p0, %p531_p11 }
  0x22   :  { %541 = shalt.err (!%p538_p1)
}
  0x23   :  { %24 = dma.hbm_to_vmem [thread:$0]  %s908_s0, 1024, %s650_s18, [#allocation3], %s618_s27, %s618_s27, %s619_s28  }
  0x24   :  { %s620_s14 = smov [#allocation7]   ;;  %s621_s16 = smov [#allocation8]  }
  0x25   :  { %s42_s15 = sshll.u32 %s620_s14, 4  ;;  %s54_s17 = sshll.u32 %s621_s16, 4  ;;  %s43_s15 = int_to_ptr.vmem [resolvable:$true] %s42_s15  ;;  %s687_s17 = int_to_ptr.vmem [resolvable:$true] %s54_s17 }
  0x26   :  { %s542_s21 = scalar_lea.hbm %s910_s2, 1024 }
  0x27   :  { %p543_p2 = scmp.ne.s32.totalorder %s910_s2, %s542_s21  ;;  %p546_p3 = scmp.lt.u32.totalorder %s542_s21, %s910_s2 }
  0x29   :  { %p548_p4 = pnand %p546_p3, %p543_p2 }
  0x2b   :  { %551 = shalt.err (!%p548_p4)
}
  0x2c   :  { %s552_s0 = scalar_lea.vmem %s43_s15, 1024  ;;  %p557_p6 = scmp.lt.s32.totalorder %s43_s15, %s43_s15 }
  0x2d   :  { %p553_p5 = scmp.ne.s32.totalorder %s43_s15, %s552_s0  ;;  %p558_p7 = scmp.lt.s32.totalorder %s552_s0, %s552_s0 }
  0x2f   :  { %p559_p8 = por %p558_p7, %p557_p6 }
  0x31   :  { %p560_p9 = pnand %p559_p8, %p553_p5 }
  0x33   :  { %563 = shalt.err (!%p560_p9)
}
  0x34   :  { %48 = dma.hbm_to_vmem [thread:$0]  %s910_s2, 1024, %s43_s15, [#allocation6], %s618_s27, %s618_s27, %s619_s28  }
  0x35   :  { %s564_s5 = scalar_lea.hbm %s911_s3, 512 }
  0x36   :  { %p565_p10 = scmp.ne.s32.totalorder %s911_s3, %s564_s5  ;;  %p568_p11 = scmp.lt.u32.totalorder %s564_s5, %s911_s3 }
  0x38   :  { %p570_p12 = pnand %p568_p11, %p565_p10 }
  0x3a   :  { %573 = shalt.err (!%p570_p12)
}
  0x3b   :  { %s574_s10 = scalar_lea.vmem %s687_s17, 512  ;;  %p579_p0 = scmp.lt.s32.totalorder %s687_s17, %s687_s17 }
  0x3c   :  { %p575_p13 = scmp.ne.s32.totalorder %s687_s17, %s574_s10  ;;  %p580_p1 = scmp.lt.s32.totalorder %s574_s10, %s574_s10 }
  0x3e   :  { %p581_p2 = por %p580_p1, %p579_p0 }
  0x40   :  { %p582_p3 = pnand %p581_p2, %p575_p13 }
  0x42   :  { %585 = shalt.err (!%p582_p3)
}
  0x43   :  { %60 = dma.hbm_to_vmem [thread:$0]  %s911_s3, 512, %s687_s17, [#allocation9], %s618_s27, %s618_s27, %s619_s28  }
  0x44   :  { %608 = dma.done.wait [#allocation3], 1024  }
  0x45   :  { %609 = vsyncadd [#allocation3], 4294966272 }
  0x46   :  { %610 = dma.done.wait [#allocation6], 2048  }
  0x47   :  { %611 = vsyncadd [#allocation6], 4294965248 }
  0x48   :  { %612 = dma.done.wait [#allocation9], 512  }
  0x49   :  { %613 = vsyncadd [#allocation9], 4294966784  ;;  %v724_v0 = vld [vmem:[#allocation8] sm:$0xff]   ;;  %v735_v7 = vld [vmem:[#allocation8 + $0x8] sm:$0xff]   ;;  %s622_s3 = smov [#allocation10]  }
  0x4a   :  { %v726_v1 = vld [vmem:[#allocation7] sm:$0xff]   ;;  %v363_v3 = vunpack.c.l.bf16 %v724_v0  ;;  %v737_v8 = vld [vmem:[#allocation7 + $0x8] sm:$0xff]   ;;  %v391_v14 = vunpack.c.l.bf16 %v735_v7  ;;  %v748_v17 = vld [vmem:[#allocation8 + $0x10] sm:$0xff]   ;;  %v364_v24 = vunpack.c.h.bf16 %v724_v0  ;;  %s347_s27 = sshll.u32 %s622_s3, 4  ;;  %s348_s27 = int_to_ptr.vmem [resolvable:$true] %s347_s27 }
  0x4b   :  { %v728_v2 = vld [vmem:[#allocation7 + $0x20] sm:$0xff]   ;;  %v367_v4 = vunpack.c.l.bf16 %v726_v1  ;;  %v739_v11 = vld [vmem:[#allocation7 + $0x28] sm:$0xff]   ;;  %v395_v15 = vunpack.c.l.bf16 %v737_v8  ;;  %v419_v21 = vunpack.c.l.bf16 %v748_v17  ;;  %v754_v22 = vld [vmem:[#allocation7 + $0x10] sm:$0xff]   ;;  %v368_v37 = vunpack.c.h.bf16 %v726_v1  ;;  %s586_s28 = scalar_lea.vmem %s348_s27, 512  ;;  %p591_p5 = scmp.lt.s32.totalorder %s348_s27, %s348_s27 }
  0x4c   :  { %v371_v5 = vunpack.c.l.bf16 %v728_v2  ;;  %v733_v6 = vld [vmem:[#allocation2] sm:$0xff]   ;;  %v399_v16 = vunpack.c.l.bf16 %v739_v11  ;;  %v756_v23 = vld [vmem:[#allocation7 + $0x30] sm:$0xff]   ;;  %v759_v27 = vld [vmem:[#allocation2 + $0x8] sm:$0xff]   ;;  %v423_v29 = vunpack.c.l.bf16 %v754_v22  ;;  %v372_v63 = vunpack.c.h.bf16 %v728_v2  ;;  %p587_p4 = scmp.ne.s32.totalorder %s348_s27, %s586_s28  ;;  %p592_p6 = scmp.lt.s32.totalorder %s586_s28, %s586_s28 }
  0x4d   :  { %v86_v9 = vmul.f32 %v367_v4, %v367_v4  ;;  %v741_v12 = vld [vmem:[#allocation2 + $0x20] sm:$0xff]   ;;  %v375_v19 = vunpack.c.l.bf16 %v733_v6  ;;  %v151_v25 = vmul.f32 %v395_v15, %v395_v15  ;;  %v761_v28 = vld [vmem:[#allocation2 + $0x28] sm:$0xff]   ;;  %v427_v30 = vunpack.c.l.bf16 %v756_v23  ;;  %v767_v34 = vld [vmem:[#allocation8 + $0x18] sm:$0xff]  }
  0x4e   :  { %v90_v10 = vmul.f32 %v371_v5, %v371_v5  ;;  %v743_v13 = vld [vmem:[#allocation5] sm:$0xff]   ;;  %v155_v26 = vmul.f32 %v399_v16, %v399_v16  ;;  %v379_v32 = vunpack.c.l.bf16 %v741_v12  ;;  %v769_v35 = vld [vmem:[#allocation7 + $0x18] sm:$0xff]   ;;  %v775_v40 = vld [vmem:[#allocation5 + $0x8] sm:$0xff]   ;;  %v218_v41 = vmul.f32 %v423_v29, %v423_v29  ;;  %p593_p7 = por %p592_p6, %p591_p5 }
  0x4f   :  { %v88_v18 = vadd.f32 %v363_v3, %v86_v9  ;;  %v751_v20 = vld [vmem:[#allocation5 + $0x20] sm:$0xff]   ;;  %v383_v33 = vunpack.c.l.bf16 %v743_v13  ;;  %v771_v36 = vld [vmem:[#allocation7 + $0x38] sm:$0xff]   ;;  %v153_v39 = vadd.f32 %v391_v14, %v151_v25  ;;  %v222_v42 = vmul.f32 %v427_v30, %v427_v30  ;;  %v777_v44 = vld [vmem:[#allocation5 + $0x28] sm:$0xff]  }
  0x50   :  { %v387_v38 = vunpack.c.l.bf16 %v751_v20  ;;  %v447_v45 = vunpack.c.l.bf16 %v767_v34  ;;  %v451_v46 = vunpack.c.l.bf16 %v769_v35  ;;  %v455_v47 = vunpack.c.l.bf16 %v771_v36  ;;  %v784_v52 = vld [vmem:[#allocation2 + $0x10] sm:$0xff]   ;;  %v794_v62 = vld [vmem:[#allocation2 + $0x18] sm:$0xff]   ;;  %p594_p8 = pnand %p593_p7, %p587_p4 }
  0x51   :  { %v92_v31 = vadd.f32 %v90_v10, %v88_v18  ;;  %v157_v48 = vadd.f32 %v155_v26, %v153_v39  ;;  %v403_v49 = vunpack.c.l.bf16 %v759_v27  ;;  %v407_v50 = vunpack.c.l.bf16 %v761_v28  ;;  %v786_v53 = vld [vmem:[#allocation2 + $0x30] sm:$0xff]   ;;  %v800_v10 = vld [vmem:[#allocation2 + $0x38] sm:$0xff]  }
  0x52   :  { %v220_v51 = vadd.f32 %v419_v21, %v218_v41  ;;  %v411_v54 = vunpack.c.l.bf16 %v775_v40  ;;  %v789_v55 = vld [vmem:[#allocation5 + $0x10] sm:$0xff]   ;;  %v285_v56 = vmul.f32 %v451_v46, %v451_v46  ;;  %v289_v57 = vmul.f32 %v455_v47, %v455_v47  ;;  %v802_v14 = vld [vmem:[#allocation5 + $0x18] sm:$0xff]  }
  0x53   :  { %v94_v43 = vmax.f32 %v92_v31, 1e-20  ;;  %v159_v58 = vmax.f32 %v157_v48, 1e-20  ;;  %v415_v59 = vunpack.c.l.bf16 %v777_v44  ;;  %v792_v61 = vld [vmem:[#allocation5 + $0x30] sm:$0xff]   ;;  %v431_v0 = vunpack.c.l.bf16 %v784_v52  ;;  %v806_v21 = vld [vmem:[#allocation5 + $0x38] sm:$0xff]  }
  0x54   :  { %v224_v60 = vadd.f32 %v222_v42, %v220_v51  ;;  %v435_v1 = vunpack.c.l.bf16 %v786_v53  ;;  %v287_v3 = vadd.f32 %v447_v45, %v285_v56  ;;  %v87_v4 = vmul.f32 %v368_v37, %v368_v37 }
  0x55   :  { %482 = vrcp.f32 %v94_v43  ;;  %v439_v9 = vunpack.c.l.bf16 %v789_v55  ;;  %v91_v15 = vmul.f32 %v372_v63, %v372_v63  ;;  %v443_v16 = vunpack.c.l.bf16 %v792_v61 }
  0x56   :  { %484 = vrcp.f32 %v159_v58  ;;  %v226_v5 = vmax.f32 %v224_v60, 1e-20  ;;  %v291_v18 = vadd.f32 %v289_v57, %v287_v3  ;;  %v459_v2 = vunpack.c.l.bf16 %v794_v62 }
  0x57   :  { %v89_v25 = vadd.f32 %v364_v24, %v87_v4  ;;  %v392_v26 = vunpack.c.h.bf16 %v735_v7  ;;  %v396_v29 = vunpack.c.h.bf16 %v737_v8  ;;  %v400_v30 = vunpack.c.h.bf16 %v739_v11 }
  0x58   :  { %486 = vrcp.f32 %v226_v5  ;;  %v293_v31 = vmax.f32 %v291_v18, 1e-20  ;;  %v463_v37 = vunpack.c.l.bf16 %v800_v10  ;;  %v467_v39 = vunpack.c.l.bf16 %v802_v14 }
  0x59   :  { %v93_v41 = vadd.f32 %v91_v15, %v89_v25  ;;  %v471_v42 = vunpack.c.l.bf16 %v806_v21  ;;  %v152_v43 = vmul.f32 %v396_v29, %v396_v29  ;;  %v156_v45 = vmul.f32 %v400_v30, %v400_v30 }
  0x5a   :  { %v420_v46 = vunpack.c.h.bf16 %v748_v17  ;;  %488 = vrcp.f32 %v293_v31  ;;  %v424_v7 = vunpack.c.h.bf16 %v754_v22  ;;  %v428_v8 = vunpack.c.h.bf16 %v756_v23 }
  0x5b   :  { %v95_v24 = vmax.f32 %v93_v41, 1e-20  ;;  %v376_v11 = vunpack.c.h.bf16 %v733_v6  ;;  %v380_v47 = vunpack.c.h.bf16 %v741_v12  ;;  %v384_v48 = vunpack.c.h.bf16 %v743_v13 }
  0x5c   :  { %v154_v51 = vadd.f32 %v392_v26, %v152_v43  ;;  %v388_v57 = vunpack.c.h.bf16 %v751_v20  ;;  %v219_v58 = vmul.f32 %v424_v7, %v424_v7  ;;  %v223_v60 = vmul.f32 %v428_v8, %v428_v8 }
  0x5d   :  { %490 = vrcp.f32 %v95_v24  ;;  %v404_v63 = vunpack.c.h.bf16 %v759_v27  ;;  %v408_v3 = vunpack.c.h.bf16 %v761_v28  ;;  %v452_v5 = vunpack.c.h.bf16 %v769_v35 }
  0x5e   :  { %v158_v23 = vadd.f32 %v156_v45, %v154_v51  ;;  %v221_v4 = vadd.f32 %v420_v46, %v219_v58  ;;  %v456_v15 = vunpack.c.h.bf16 %v771_v36  ;;  %v448_v12 = vunpack.c.h.bf16 %v767_v34 }
  0x5f   :  { %v483_v56 = vpop.eup %482  ;;  %v286_v35 = vmul.f32 %v452_v5, %v452_v5  ;;  %v412_v31 = vunpack.c.h.bf16 %v775_v40  ;;  %v416_v45 = vunpack.c.h.bf16 %v777_v44  ;;  %v432_v58 = vunpack.c.h.bf16 %v784_v52 }
  0x60   :  { %v102_v17 = vmul.f32 %v483_v56, %v375_v19  ;;  %v109_v22 = vmul.f32 %v483_v56, %v379_v32  ;;  %v485_v18 = vpop.eup %484  ;;  %v160_v19 = vmax.f32 %v158_v23, 1e-20  ;;  %v225_v29 = vadd.f32 %v223_v60, %v221_v4 }
  0x61   :  { %v168_v32 = vmul.f32 %v485_v18, %v403_v49  ;;  %v175_v26 = vmul.f32 %v485_v18, %v407_v50  ;;  %v290_v41 = vmul.f32 %v456_v15, %v456_v15  ;;  %v288_v24 = vadd.f32 %v448_v12, %v286_v35 }
  0x62   :  { %v120_v25 = vmul.f32 %v383_v33, %v102_v17  ;;  %v124_v6 = vmul.f32 %v387_v38, %v109_v22  ;;  %v487_v30 = vpop.eup %486  ;;  %492 = vrcp.f32 %v160_v19  ;;  %v227_v46 = vmax.f32 %v225_v29, 1e-20 }
  0x63   :  { %v187_v43 = vmul.f32 %v411_v54, %v168_v32  ;;  %v191_v34 = vmul.f32 %v415_v59, %v175_v26  ;;  %v235_v49 = vmul.f32 %v487_v30, %v431_v0  ;;  %v242_v50 = vmul.f32 %v487_v30, %v435_v1 }
  0x64   :  { %v126_v36 = vadd.f32 %v124_v6, %v120_v25  ;;  %v128_v7 = vmul.f32 %v383_v33, %v109_v22  ;;  %v489_v8 = vpop.eup %488  ;;  %v132_v0 = vmul.f32 %v387_v38, %v102_v17  ;;  %494 = vrcp.f32 %v227_v46 }
  0x65   :  { %v254_v56 = vmul.f32 %v439_v9, %v235_v49  ;;  %v258_v60 = vmul.f32 %v443_v16, %v242_v50  ;;  %v302_v1 = vmul.f32 %v489_v8, %v459_v2  ;;  %v292_v23 = vadd.f32 %v290_v41, %v288_v24 }
  0x66   :  { %v189_v51 = vadd.f32 %v187_v43, %v126_v36  ;;  %v134_v22 = vsub.f32 %v128_v7, %v132_v0  ;;  %v195_v5 = vmul.f32 %v411_v54, %v175_v26  ;;  %v199_v52 = vmul.f32 %v415_v59, %v168_v32 }
  0x67   :  { %v491_v4 = vpop.eup %490  ;;  %v309_v38 = vmul.f32 %v489_v8, %v463_v37  ;;  %v321_v17 = vmul.f32 %v467_v39, %v302_v1  ;;  %v294_v25 = vmax.f32 %v292_v23, 1e-20  ;;  %v262_v19 = vmul.f32 %v439_v9, %v242_v50 }
  0x68   :  { %v193_v33 = vadd.f32 %v191_v34, %v189_v51  ;;  %v103_v15 = vmul.f32 %v491_v4, %v376_v11  ;;  %v110_v18 = vmul.f32 %v491_v4, %v380_v47  ;;  %v197_v6 = vadd.f32 %v195_v5, %v134_v22 }
  0x69   :  { %v325_v40 = vmul.f32 %v471_v42, %v309_v38  ;;  %v436_v59 = vunpack.c.h.bf16 %v786_v53  ;;  %496 = vrcp.f32 %v294_v25  ;;  %v266_v47 = vmul.f32 %v443_v16, %v235_v49 }
  0x6a   :  { %v256_v2 = vadd.f32 %v254_v56, %v193_v33  ;;  %v121_v44 = vmul.f32 %v384_v48, %v103_v15  ;;  %v125_v54 = vmul.f32 %v388_v57, %v110_v18  ;;  %v201_v11 = vsub.f32 %v197_v6, %v199_v52 }
  0x6b   :  { %v329_v9 = vmul.f32 %v467_v39, %v309_v38  ;;  %v129_v26 = vmul.f32 %v384_v48, %v110_v18  ;;  %v133_v29 = vmul.f32 %v388_v57, %v103_v15  ;;  %v440_v16 = vunpack.c.h.bf16 %v789_v55 }
  0x6c   :  { %v260_v37 = vadd.f32 %v258_v60, %v256_v2  ;;  %v493_v12 = vpop.eup %492  ;;  %v127_v32 = vadd.f32 %v125_v54, %v121_v44  ;;  %v264_v36 = vadd.f32 %v262_v19, %v201_v11  ;;  %v444_v41 = vunpack.c.h.bf16 %v792_v61 }
  0x6d   :  { %v169_v53 = vmul.f32 %v493_v12, %v404_v63  ;;  %v176_v30 = vmul.f32 %v493_v12, %v408_v3  ;;  %v333_v39 = vmul.f32 %v471_v42, %v302_v1  ;;  %v135_v13 = vsub.f32 %v129_v26, %v133_v29 }
  0x6e   :  { %v323_v35 = vadd.f32 %v321_v17, %v260_v37  ;;  %v268_v57 = vsub.f32 %v264_v36, %v266_v47  ;;  %v495_v34 = vpop.eup %494  ;;  %v460_v55 = vunpack.c.h.bf16 %v794_v62  ;;  %v464_v61 = vunpack.c.h.bf16 %v800_v10 }
  0x6f   :  { %v188_v43 = vmul.f32 %v412_v31, %v169_v53  ;;  %v192_v20 = vmul.f32 %v416_v45, %v176_v30  ;;  %v196_v49 = vmul.f32 %v412_v31, %v176_v30  ;;  %v200_v27 = vmul.f32 %v416_v45, %v169_v53 }
  0x70   :  { %v327_v48 = vadd.f32 %v325_v40, %v323_v35  ;;  %v236_v28 = vmul.f32 %v495_v34, %v432_v58  ;;  %v243_v3 = vmul.f32 %v495_v34, %v436_v59  ;;  %v331_v50 = vadd.f32 %v329_v9, %v268_v57 }
  0x71   :  { %v190_v63 = vadd.f32 %v188_v43, %v127_v32  ;;  %v468_v46 = vunpack.c.h.bf16 %v802_v14  ;;  %v198_v42 = vadd.f32 %v196_v49, %v135_v13  ;;  %v472_v56 = vunpack.c.h.bf16 %v806_v21 }
  0x72   :  { %337 = vst [vmem:[#allocation10] sm:$0xff] %v327_v48  ;;  %v255_v7 = vmul.f32 %v440_v16, %v236_v28  ;;  %v259_v8 = vmul.f32 %v444_v41, %v243_v3  ;;  %v335_v51 = vsub.f32 %v331_v50, %v333_v39  ;;  %v263_v45 = vmul.f32 %v440_v16, %v243_v3 }
  0x73   :  { %v194_v24 = vadd.f32 %v192_v20, %v190_v63  ;;  %v202_v31 = vsub.f32 %v198_v42, %v200_v27  ;;  %v267_v0 = vmul.f32 %v444_v41, %v236_v28  ;;  %v497_v60 = vpop.eup %496 }
  0x74   :  { %340 = vst [vmem:[#allocation10 + $0x10] sm:$0xff] %v335_v51  ;;  %v303_v1 = vmul.f32 %v497_v60, %v460_v55  ;;  %v310_v23 = vmul.f32 %v497_v60, %v464_v61 }
  0x75   :  { %v257_v58 = vadd.f32 %v255_v7, %v194_v24  ;;  %v265_v62 = vadd.f32 %v263_v45, %v202_v31 }
  0x76   :  { %v322_v10 = vmul.f32 %v468_v46, %v303_v1  ;;  %v326_v33 = vmul.f32 %v472_v56, %v310_v23  ;;  %v330_v22 = vmul.f32 %v468_v46, %v310_v23  ;;  %v334_v5 = vmul.f32 %v472_v56, %v303_v1 }
  0x77   :  { %v261_v4 = vadd.f32 %v259_v8, %v257_v58  ;;  %v269_v14 = vsub.f32 %v265_v62, %v267_v0 }
  0x79   :  { %v324_v52 = vadd.f32 %v322_v10, %v261_v4  ;;  %v332_v38 = vadd.f32 %v330_v22, %v269_v14 }
  0x7b   :  { %v328_v21 = vadd.f32 %v326_v33, %v324_v52  ;;  %v336_v17 = vsub.f32 %v332_v38, %v334_v5 }
  0x7d   :  { %338 = vst [vmem:[#allocation10 + $0x8] sm:$0xff] %v328_v21  ;;  %341 = vst [vmem:[#allocation10 + $0x18] sm:$0xff] %v336_v17 }
  0x7e   :  { %597 = shalt.err (!%p594_p8)
}
  0x7f   :  { %s598_s13 = scalar_lea.hbm %s912_s4, 512 }
  0x80   :  { %p599_p9 = scmp.ne.s32.totalorder %s912_s4, %s598_s13  ;;  %p602_p10 = scmp.lt.u32.totalorder %s598_s13, %s912_s4 }
  0x82   :  { %p604_p11 = pnand %p602_p10, %p599_p9 }
  0x84   :  { %607 = shalt.err (!%p604_p11)
}
  0x85   :  { %s623_s19 = smov 128   ;;  %s624_s20 = smov 8  }
  0x86   :  { %353 = dma.vmem_to_hbm [thread:$0]  %s348_s27, 512, %s912_s4, [#allocation4], %s623_s19, %s623_s19, %s624_s20  }
  0x87   :  { %614 = dma.done.wait [#allocation4], 512  }
  0x88   :  { %615 = vsyncadd [#allocation4], 4294966784 }
  0x89   :  { %357 = vsyncpa [#allocation3], 1 }
  0x8a   :  { %358 = vsyncpa [#allocation6], 1 }
  0x8b   :  { %359 = vsyncpa [#allocation9], 1 }
  0x8c   :  { %360 = vsyncpa [#allocation4], 1 }

</bundles_post_ra>
